<compile_context>
chip_gen: v7x
topology: tpu7x:2x2x1
jax: 0.10.0
libtpu: 0.0.40
codegen_flags: <defaults>
</compile_context>

<pallas_src>
import functools

import jax
import jax.numpy as jnp
from jax.experimental import pallas as pl
from jax.experimental.pallas import tpu as pltpu


def _round_up(x, m):
    return ((x + m - 1) // m) * m


def mlp_critic_kernel(xT_ref, w1t_ref, b1_ref, w2t_ref, b2_ref, w3_ref, b3_ref,
                      out_ref, *, compute_dtype):
    """One batch tile, batch-in-lanes:

        out_row = w3 . tanh(W2 tanh(W1 x + b1) + b2) + b3        # (1, TILE_B)

    Intermediates are (hidden, TILE_B): hidden on sublanes, batch on lanes, so
    all elementwise work is lane-dense even for hidden < 128.
    """
    xT = xT_ref[...]                                               # (obs_dim, TILE_B)
    h1 = jnp.tanh(
        jnp.dot(w1t_ref[...], xT, preferred_element_type=jnp.float32)
        + b1_ref[...])                                             # (H1, TILE_B) f32
    h2 = jnp.tanh(
        jnp.dot(w2t_ref[...], h1.astype(compute_dtype),
                preferred_element_type=jnp.float32)
        + b2_ref[...])                                             # (H2, TILE_B) f32
    v = jnp.dot(w3_ref[...], h2.astype(compute_dtype),
                preferred_element_type=jnp.float32)                # (1, TILE_B)
    out_ref[...] = (v + b3_ref[0, 0]).astype(out_ref.dtype)


def mlp_critic_forward(obs, params, *, tile_b=1024, compute_dtype=jnp.float32):
    """Fused critic forward. Returns shape (batch,), like torch.squeeze(v, -1)."""
    (w1, b1), (w2, b2), (w3, b3) = params
    batch, obs_dim = obs.shape
    h1 = w1.shape[1]
    h2 = w2.shape[1]

    # Pre-transpose (and pre-cast) parameters once in the wrapper.
    w1t = w1.T.astype(compute_dtype)                 # (H1, obs_dim)
    w2t = w2.T.astype(compute_dtype)                 # (H2, H1)
    w3r = w3.T.astype(compute_dtype)                 # (1, H2)
    b1c = b1.reshape(h1, 1).astype(jnp.float32)      # bias adds stay f32
    b2c = b2.reshape(h2, 1).astype(jnp.float32)
    b3s = b3.reshape(1, 1).astype(jnp.float32)       # SMEM scalar

    # Batch tile: multiple of 128 (lanes). Keep >= 2 tiles when the 128-rounded
    # batch splits evenly so the "parallel" axis can use both v7x TensorCores.
    cap = _round_up(max(int(tile_b), 128), 128)
    b128 = _round_up(batch, 128)
    if b128 <= cap:
        tile = b128 // 2 if (b128 >= 256 and b128 % 256 == 0) else b128
    else:
        tile = cap
    num_tiles = pl.cdiv(batch, tile)
    padded_b = num_tiles * tile

    # Pad + transpose + cast: one fused wrapper-side layout copy.
    obs_p = obs if padded_b == batch else jnp.pad(obs, ((0, padded_b - batch), (0, 0)))
    obs_t = obs_p.T.astype(compute_dtype)            # (obs_dim, padded_b)

    itemsize = jnp.dtype(compute_dtype).itemsize
    param_bytes = (w1t.size + w2t.size + w3r.size) * itemsize + 4 * (h1 + h2 + 1)
    cost = pl.CostEstimate(
        flops=2 * padded_b * (obs_dim * h1 + h1 * h2 + h2),
        transcendentals=padded_b * (h1 + h2),
        bytes_accessed=padded_b * obs_dim * itemsize + param_bytes + padded_b * 4,
    )

    const = lambda i: (0, 0)

    out = pl.pallas_call(
        functools.partial(mlp_critic_kernel, compute_dtype=compute_dtype),
        out_shape=jax.ShapeDtypeStruct((1, padded_b), jnp.float32),
        grid=(num_tiles,),
        in_specs=[
            pl.BlockSpec((obs_dim, tile), lambda i: (0, i)),     # obs tile, batch on lanes
            pl.BlockSpec(w1t.shape, const),                      # VMEM-resident weights
            pl.BlockSpec(b1c.shape, const),
            pl.BlockSpec(w2t.shape, const),
            pl.BlockSpec(b2c.shape, const),
            pl.BlockSpec(w3r.shape, const),
            pl.BlockSpec(memory_space=pltpu.MemorySpace.SMEM),   # b3 scalar
        ],
        out_specs=pl.BlockSpec((1, tile), lambda i: (0, i)),     # lane-dense output row
        compiler_params=pltpu.CompilerParams(
            dimension_semantics=("parallel",),
            vmem_limit_bytes=32 * 1024 * 1024,
        ),
        cost_estimate=cost,
    )(obs_t, w1t, b1c, w2t, b2c, w3r, b3s)

    # torch.squeeze(v_net(obs), -1): (B, 1) -> (B,)  (drop batch padding).
    return out.reshape(padded_b)[:batch]


def init_linear(key, in_dim, out_dim):
    """PyTorch-style Linear init (uniform +/- 1/sqrt(fan_in)).

    W has shape [in_dim, out_dim] (transposed vs. torch), b is [1, out_dim].
    """
    kw, kb = jax.random.split(key)
    bound = 1.0 / jnp.sqrt(jnp.float32(in_dim))
    w = jax.random.uniform(kw, (in_dim, out_dim), jnp.float32, -bound, bound)
    b = jax.random.uniform(kb, (1, out_dim), jnp.float32, -bound, bound)
    return w, b


def make_params(key, obs_dim, hidden_sizes):
    sizes = [obs_dim] + list(hidden_sizes) + [1]
    params = []
    for j in range(len(sizes) - 1):
        key, sub = jax.random.split(key)
        params.append(init_linear(sub, sizes[j], sizes[j + 1]))
    return params


def reference_forward(obs, params):
    """Pure-JAX reference of the same math (sanity check)."""
    (w1, b1), (w2, b2), (w3, b3) = params
    h1 = jnp.tanh(obs @ w1 + b1)
    h2 = jnp.tanh(h1 @ w2 + b2)
    v = h2 @ w3 + b3
    return jnp.squeeze(v, axis=-1)


if __name__ == "__main__":
    key = jax.random.PRNGKey(0)
    k_obs, k_params = jax.random.split(key)

    batch = 8
    obs_dim = 16
    hidden_sizes = (32, 32)

    obs = jax.random.normal(k_obs, (batch, obs_dim), dtype=jnp.float32)
    params = make_params(k_params, obs_dim, hidden_sizes)

    v = mlp_critic_forward(obs, params)
    v = jax.block_until_ready(v)

    v_ref = reference_forward(obs, params)
    assert v.shape == (batch,), v.shape
    assert jnp.allclose(v, v_ref, atol=1e-4, rtol=1e-4), (v, v_ref)

    # Ragged-batch check: partial final tile + multi-tile grid path.
    batch2 = 300
    obs2 = jax.random.normal(jax.random.PRNGKey(1), (batch2, obs_dim), jnp.float32)
    v2 = jax.block_until_ready(mlp_critic_forward(obs2, params, tile_b=128))
    assert v2.shape == (batch2,), v2.shape
    assert jnp.allclose(v2, reference_forward(obs2, params), atol=1e-4, rtol=1e-4)

    print("KERNEL_OK")
</pallas_src>

<mosaic_0001>
module attributes {stable_mosaic.version = 11 : i64} {
  func.func @mlp_critic_kernel(%arg0: i32, %arg1: memref<16x128xf32, #tpu.memory_space<vmem>>, %arg2: memref<32x16xf32, #tpu.memory_space<vmem>>, %arg3: memref<32x1xf32, #tpu.memory_space<vmem>>, %arg4: memref<32x32xf32, #tpu.memory_space<vmem>>, %arg5: memref<32x1xf32, #tpu.memory_space<vmem>>, %arg6: memref<1x32xf32, #tpu.memory_space<vmem>>, %arg7: memref<1x1xf32, #tpu.memory_space<smem>>, %arg8: memref<1x128xf32, #tpu.memory_space<vmem>>) attributes {dimension_semantics = [#tpu.dimension_semantics<parallel>], iteration_bounds = array<i64: 1>, scalar_prefetch = 0 : i64, scratch_operands = 0 : i64, tpu.core_type = #tpu.core_type<tc>, window_params = [{transform_indices = @transform_0, window_bounds = array<i64: 16, 128>}, {pipeline_mode = #tpu.pipeline_mode<synchronous>, transform_indices = @transform_1, window_bounds = array<i64: 32, 16>}, {pipeline_mode = #tpu.pipeline_mode<synchronous>, transform_indices = @transform_2, window_bounds = array<i64: 32, 1>}, {pipeline_mode = #tpu.pipeline_mode<synchronous>, transform_indices = @transform_3, window_bounds = array<i64: 32, 32>}, {pipeline_mode = #tpu.pipeline_mode<synchronous>, transform_indices = @transform_4, window_bounds = array<i64: 32, 1>}, {pipeline_mode = #tpu.pipeline_mode<synchronous>, transform_indices = @transform_5, window_bounds = array<i64: 1, 32>}, {transform_indices = @transform_6, window_bounds = array<i64: 1, 1>}, {transform_indices = @transform_7, window_bounds = array<i64: 1, 128>}]} {
    %c0 = arith.constant 0 : index
    %c0_0 = arith.constant 0 : index
    %0 = vector.load %arg1[%c0, %c0_0] : memref<16x128xf32, #tpu.memory_space<vmem>>, vector<16x128xf32>
    %c0_1 = arith.constant 0 : index
    %c0_2 = arith.constant 0 : index
    %1 = vector.load %arg2[%c0_1, %c0_2] : memref<32x16xf32, #tpu.memory_space<vmem>>, vector<32x16xf32>
    %cst = arith.constant dense<0.000000e+00> : vector<32x128xf32>
    %2 = tpu.matmul %1, %0, %cst {dimension_numbers = #tpu.dot_dimension_numbers<[1], [0], [0], [1], [0, 0, 1, 1], [], []>} : vector<32x16xf32>, vector<16x128xf32>, vector<32x128xf32> -> vector<32x128xf32>
    %c0_3 = arith.constant 0 : index
    %c0_4 = arith.constant 0 : index
    %3 = vector.load %arg3[%c0_3, %c0_4] : memref<32x1xf32, #tpu.memory_space<vmem>>, vector<32x1xf32>
    %4 = vector.broadcast %3 : vector<32x1xf32> to vector<32x128xf32>
    %5 = arith.addf %2, %4 : vector<32x128xf32>
    %6 = math.tanh %5 : vector<32x128xf32>
    %c0_5 = arith.constant 0 : index
    %c0_6 = arith.constant 0 : index
    %7 = vector.load %arg4[%c0_5, %c0_6] : memref<32x32xf32, #tpu.memory_space<vmem>>, vector<32x32xf32>
    %cst_7 = arith.constant dense<0.000000e+00> : vector<32x128xf32>
    %8 = tpu.matmul %7, %6, %cst_7 {dimension_numbers = #tpu.dot_dimension_numbers<[1], [0], [0], [1], [0, 0, 1, 1], [], []>} : vector<32x32xf32>, vector<32x128xf32>, vector<32x128xf32> -> vector<32x128xf32>
    %c0_8 = arith.constant 0 : index
    %c0_9 = arith.constant 0 : index
    %9 = vector.load %arg5[%c0_8, %c0_9] : memref<32x1xf32, #tpu.memory_space<vmem>>, vector<32x1xf32>
    %10 = vector.broadcast %9 : vector<32x1xf32> to vector<32x128xf32>
    %11 = arith.addf %8, %10 : vector<32x128xf32>
    %12 = math.tanh %11 : vector<32x128xf32>
    %c0_10 = arith.constant 0 : index
    %c0_11 = arith.constant 0 : index
    %13 = vector.load %arg6[%c0_10, %c0_11] : memref<1x32xf32, #tpu.memory_space<vmem>>, vector<1x32xf32>
    %cst_12 = arith.constant dense<0.000000e+00> : vector<1x128xf32>
    %14 = tpu.matmul %13, %12, %cst_12 {dimension_numbers = #tpu.dot_dimension_numbers<[1], [0], [0], [1], [0, 0, 1, 1], [], []>} : vector<1x32xf32>, vector<32x128xf32>, vector<1x128xf32> -> vector<1x128xf32>
    %c0_13 = arith.constant 0 : index
    %c0_14 = arith.constant 0 : index
    %15 = memref.load %arg7[%c0_13, %c0_14] : memref<1x1xf32, #tpu.memory_space<smem>>
    %16 = vector.broadcast %15 : f32 to vector<1x128xf32>
    %17 = arith.addf %14, %16 : vector<1x128xf32>
    %c0_15 = arith.constant 0 : index
    %c0_16 = arith.constant 0 : index
    %18 = vector.load %arg8[%c0_15, %c0_16] : memref<1x128xf32, #tpu.memory_space<vmem>>, vector<1x128xf32>
    tpu.vector_store %arg8[%c0_15, %c0_16], %17 {strides = array<i32>} : memref<1x128xf32, #tpu.memory_space<vmem>>, vector<1x128xf32>,
    return
  }
  func.func @transform_0(%arg0: i32) -> (i32, i32) {
    %c0_i32 = arith.constant 0 : i32
    %c0_i32_0 = arith.constant 0 : i32
    return %c0_i32, %arg0 : i32, i32
  }
  func.func @transform_1(%arg0: i32) -> (i32, i32) {
    %c0_i32 = arith.constant 0 : i32
    %c0_i32_0 = arith.constant 0 : i32
    %c0_i32_1 = arith.constant 0 : i32
    return %c0_i32, %c0_i32_0 : i32, i32
  }
  func.func @transform_2(%arg0: i32) -> (i32, i32) {
    %c0_i32 = arith.constant 0 : i32
    %c0_i32_0 = arith.constant 0 : i32
    %c0_i32_1 = arith.constant 0 : i32
    return %c0_i32, %c0_i32_0 : i32, i32
  }
  func.func @transform_3(%arg0: i32) -> (i32, i32) {
    %c0_i32 = arith.constant 0 : i32
    %c0_i32_0 = arith.constant 0 : i32
    %c0_i32_1 = arith.constant 0 : i32
    return %c0_i32, %c0_i32_0 : i32, i32
  }
  func.func @transform_4(%arg0: i32) -> (i32, i32) {
    %c0_i32 = arith.constant 0 : i32
    %c0_i32_0 = arith.constant 0 : i32
    %c0_i32_1 = arith.constant 0 : i32
    return %c0_i32, %c0_i32_0 : i32, i32
  }
  func.func @transform_5(%arg0: i32) -> (i32, i32) {
    %c0_i32 = arith.constant 0 : i32
    %c0_i32_0 = arith.constant 0 : i32
    %c0_i32_1 = arith.constant 0 : i32
    return %c0_i32, %c0_i32_0 : i32, i32
  }
  func.func @transform_6(%arg0: i32) -> (i32, i32) {
    %c0_i32 = arith.constant 0 : i32
    %c0_i32_0 = arith.constant 0 : i32
    %c0_i32_1 = arith.constant 0 : i32
    return %c0_i32, %c0_i32_0 : i32, i32
  }
  func.func @transform_7(%arg0: i32) -> (i32, i32) {
    %c0_i32 = arith.constant 0 : i32
    %c0_i32_0 = arith.constant 0 : i32
    return %c0_i32, %arg0 : i32, i32
  }
}

</mosaic_0001>

<bundles_post_ra>
// kernel: tpu_custom_call.1
= control target key start
LH: loop header
LB: loop body
LE: loop exit
PB: predicated region body
PF: predicated region fallthrough
CT: control target
= control target key end

     0   :  { %vm58_vm0 = vcmask 130048   ;;  %v509_v4 = vmov 0   ;;  %s635_s0 = inlined_call_operand.vmem [shape: f32[16,128], index: 0, kind: input, shape index: {}]   ;;  %s636_s1 = inlined_call_operand.vmem [shape: f32[32,16], index: 1, kind: input, shape index: {}]   ;;  %s637_s2 = inlined_call_operand.vmem [shape: f32[32,1], index: 2, kind: input, shape index: {}]   ;;  %s638_s3 = inlined_call_operand.vmem [shape: f32[32,32], index: 3, kind: input, shape index: {}]   ;;  %s639_s4 = inlined_call_operand.vmem [shape: f32[32,1], index: 4, kind: input, shape index: {}]   ;;  %s640_s5 = inlined_call_operand.vmem [shape: f32[1,32], index: 5, kind: input, shape index: {}]   ;;  %s641_s6 = inlined_call_operand.<no memory space> [shape: f32[1,1], index: 6, kind: input, shape index: {}]   ;;  %s642_s7 = inlined_call_operand.hbm [shape: f32[1,128], index: 7, kind: output, shape index: {}]  }
   0x1   :  { %v28_v0 = vld [vmem:[%s635_s0] sm:$0xff]  ;;  %v29_v1 = vld [vmem:[%s635_s0 + $0x8] sm:$0xff]  ;;  %467 = vset.pattern.permute.xlu0 %v509_v4  ;;  %468 = vset.pattern.permute.xlu1 %v509_v4  ;;  %v36_v6 = vld [vmem:[%s637_s2 + $0x10] sm:$0xff] }
   0x2   :  { %v30_v2 = vld [vmem:[%s636_s1] sm:$0xff]  ;;  %v444_v3 = vpack.c.bf16 %v29_v1, %v28_v0  ;;  %v31_v7 = vld [vmem:[%s636_s1 + $0x8] sm:$0xff]  ;;  %50 = vperm.xlu1 %468, %v36_v6  }
   0x3   :  { %413 = vmatprep.mubr.msk.f32.mxu0 %vm58_vm0, %v30_v2  ;;  %v34_v5 = vld [vmem:[%s637_s2] sm:$0xff]  ;;  %v35_v8 = vld [vmem:[%s637_s2 + $0x8] sm:$0xff] }
   0x4   :  { %445 = vmatprep.subr.bf16.mxu0 %v444_v3  ;;  %40 = vperm.xlu0 %467, %v34_v5  }
   0x5   :  { %447 = vmatpush3.bf16.msra.mxu0 %v444_v3 }
   0x6   :  { %13 = vsyncpa [#allocation4], 0  ;;  %v32_v9 = vld [vmem:[%s636_s1 + $0x10] sm:$0xff]  ;;  %v37_v10 = vld [vmem:[%s637_s2 + $0x18] sm:$0xff]  ;;  %vm188_vm1 = vcmask 261120   ;;  %v510_v38 = vmov 0.0|0.0   ;;  %v292_v59 = vstv %s641_s6 }
   0x7   :  { %v33_v11 = vld [vmem:[%s636_s1 + $0x18] sm:$0xff]  ;;  %55 = vperm.xlu1 %468, %v37_v10   ;;  %v164_v12 = vld [vmem:[%s639_s4] sm:$0xff]  ;;  %v165_v13 = vld [vmem:[%s639_s4 + $0x8] sm:$0xff]  ;;  %456 = vmatprep.subr.bf16.mxu0 %v510_v38  ;;  %vm511_vm2 = vmmov 0   ;;  %v512_v39 = vmov 0.0   ;;  %s513_s12 = smov [#allocation3]  }
   0x8   :  { %414 = vmatmul.mubr.msk.f32.vlgmr.msra.gmra.mrb[0].mxu0 %vm58_vm0, %v31_v7  ;;  %45 = vperm.xlu0 %467, %v35_v8   ;;  %v166_v14 = vld [vmem:[%s639_s4 + $0x10] sm:$0xff]  ;;  %v167_v15 = vld [vmem:[%s639_s4 + $0x18] sm:$0xff]  ;;  %v160_v16 = vld [vmem:[%s638_s3] sm:$0xff]  ;;  %s373_s13 = sshll.u32 %s513_s12, 4  ;;  %s374_s13 = int_to_ptr.vmem [resolvable:$true] %s373_s13 }
   0x9   :  { %416 = vmatprep.mubr.msk.f32.mxu0 %vm58_vm0, %v32_v9  ;;  %427 = vmatprep.mubr.msk.f32.mxu1 %vm188_vm1, %v160_v16  ;;  %v161_v35 = vld [vmem:[%s638_s3 + $0x8] sm:$0xff]  ;;  %v162_v36 = vld [vmem:[%s638_s3 + $0x10] sm:$0xff]  ;;  %v163_v37 = vld [vmem:[%s638_s3 + $0x18] sm:$0xff]  ;;  %s485_s14 = scalar_lea.vmem %s374_s13, 16  ;;  %s489_s15 = scalar_lea.vmem %s374_s13, 32 }
   0xa   :  { %v290_v58 = vld [vmem:[%s640_s5] sm:$0x1]  ;;  %p486_p0 = scmp.ne.s32.totalorder %s374_s13, %s485_s14  ;;  %p490_p1 = scmp.lt.s32.totalorder %s374_s13, %s374_s13 }
   0xb   :  { %175 = vperm.xlu1 %468, %v165_v13   ;;  %p491_p2 = scmp.lt.s32.totalorder %s489_s15, %s485_s14 }
   0xc   :  { %417 = vmatmul.mubr.msk.f32.gmra.mrb[2].mxu0 %vm58_vm0, %v33_v11  ;;  %170 = vperm.xlu0 %467, %v164_v12  }
   0xd   :  { %441 = vmatprep.mubr.msk.f32.mxu0 %vm511_vm2, %v512_v39  ;;  %p492_p3 = por %p491_p2, %p490_p1 }
   0xf   :  { %185 = vperm.xlu1 %468, %v167_v15   ;;  %p493_p4 = pnand %p492_p3, %p486_p0 }
  0x10   :  { %180 = vperm.xlu0 %467, %v166_v14  }
  0x81   :  { %v51_v18 = vpop.permute.xlu1 %50 }
  0x83   :  { %v41_v17 = vpop.permute.xlu0 %40 }
  0x86   :  { %v56_v24 = vpop.permute.xlu1 %55 }
  0x87   :  { %v46_v19 = vpop.permute.xlu0 %45 }
  0x8a   :  { %v176_v40 = vpop.permute.xlu1 %175 }
  0x8b   :  { %v171_v41 = vpop.permute.xlu0 %170 }
  0x8e   :  { %v186_v46 = vpop.permute.xlu1 %185 }
  0x8f   :  { %v181_v48 = vpop.permute.xlu0 %180 }
  0xdb   :  { %v415_v20 = vpop.f32.mrb[0].mxu0 }
  0xdc   :  { %v143_v21 = vadd.f32 %v415_v20, %v46_v19  ;;  %v137_v22 = vpop.f32.mrb[1].mxu0 }
  0xdd   :  { %v138_v23 = vadd.f32 %v137_v22, %v41_v17 }
  0xde   :  { %469 = vtanh.f32 %v143_v21 }
  0xdf   :  { %471 = vtanh.f32 %v138_v23  ;;  %v418_v25 = vpop.f32.mrb[2].mxu0 }
  0xe0   :  { %v153_v26 = vadd.f32 %v418_v25, %v56_v24  ;;  %v147_v27 = vpop.f32.mrb[3].mxu0 }
  0xe1   :  { %v148_v28 = vadd.f32 %v147_v27, %v51_v18 }
  0xe2   :  { %473 = vtanh.f32 %v153_v26 }
  0xe3   :  { %475 = vtanh.f32 %v148_v28 }
  0xe8   :  { %v470_v29 = vpop.eup %469 }
  0xe9   :  { %v472_v30 = vpop.eup %471 }
  0xea   :  { %v448_v31 = vpack.c.bf16 %v470_v29, %v472_v30 }
  0xec   :  { %v474_v32 = vpop.eup %473  ;;  %449 = vmatprep.subr.bf16.mxu1 %v448_v31 }
  0xed   :  { %v476_v33 = vpop.eup %475  ;;  %451 = vmatpush3.bf16.msra.mxu1 %v448_v31 }
  0xee   :  { %v452_v34 = vpack.c.bf16 %v474_v32, %v476_v33 }
  0xf0   :  { %453 = vmatprep.subr.bf16.mxu1 %v452_v34 }
  0xf1   :  { %455 = vmatpush3.bf16.msra.mxu1 %v452_v34 }
  0xf4   :  { %428 = vmatmul.mubr.msk.f32.vlgmr.msra.gmra.mrb[0].mxu1 %vm188_vm1, %v161_v35 }
  0xf5   :  { %430 = vmatprep.mubr.msk.f32.mxu1 %vm188_vm1, %v162_v36 }
  0xf8   :  { %431 = vmatmul.mubr.msk.f32.gmra.mrb[2].mxu1 %vm188_vm1, %v163_v37 }
 0x1c7   :  { %v429_v42 = vpop.f32.mrb[0].mxu1 }
 0x1c8   :  { %v273_v43 = vadd.f32 %v429_v42, %v176_v40  ;;  %v267_v44 = vpop.f32.mrb[1].mxu1 }
 0x1c9   :  { %v268_v45 = vadd.f32 %v267_v44, %v171_v41 }
 0x1ca   :  { %477 = vtanh.f32 %v273_v43 }
 0x1cb   :  { %479 = vtanh.f32 %v268_v45  ;;  %v432_v47 = vpop.f32.mrb[2].mxu1 }
 0x1cc   :  { %v283_v49 = vadd.f32 %v432_v47, %v186_v46  ;;  %v277_v50 = vpop.f32.mrb[3].mxu1 }
 0x1cd   :  { %v278_v51 = vadd.f32 %v277_v50, %v181_v48 }
 0x1ce   :  { %481 = vtanh.f32 %v283_v49 }
 0x1cf   :  { %483 = vtanh.f32 %v278_v51 }
 0x1d4   :  { %v478_v52 = vpop.eup %477 }
 0x1d5   :  { %v480_v53 = vpop.eup %479 }
 0x1d6   :  { %v457_v54 = vpack.c.bf16 %v478_v52, %v480_v53 }
 0x1d8   :  { %v482_v55 = vpop.eup %481  ;;  %458 = vmatpush3.bf16.msra.mxu0 %v457_v54 }
 0x1d9   :  { %v484_v56 = vpop.eup %483  ;;  %459 = vmatprep.subr.bf16.mxu0 %v510_v38 }
 0x1da   :  { %v460_v57 = vpack.c.bf16 %v482_v55, %v484_v56 }
 0x1dc   :  { %461 = vmatpush3.bf16.msra.mxu0 %v460_v57 }
 0x1df   :  { %442 = vmatmul.mubr.msk.f32.vlgmr.msra.gmra.mrb[4].mxu0 %vm188_vm1, %v290_v58 }
 0x2b2   :  { %v362_v60 = vpop.f32.mrb[4].mxu0 }
 0x2b3   :  { %v363_v61 = vadd.f32 %v362_v60, %v292_v59  ;;  %v443_v62 = vpop.f32.mrb[5].mxu0 }
 0x2b5   :  { %366 = vst [vmem:[#allocation3] sm:$0x1] %v363_v61 }
 0x2b6   :  { %496 = shalt.err (!%p493_p4)
}
 0x2b7   :  { %s497_s17 = scalar_lea.hbm %s642_s7, 16 }
 0x2b8   :  { %p498_p5 = scmp.ne.s32.totalorder %s642_s7, %s497_s17  ;;  %p501_p6 = scmp.lt.u32.totalorder %s497_s17, %s642_s7 }
 0x2ba   :  { %p503_p7 = pnand %p501_p6, %p498_p5 }
 0x2bc   :  { %506 = shalt.err (!%p503_p7)
}
 0x2bd   :  { %376 = dma.vmem_to_hbm [thread:$0]  %s374_s13, 16, %s642_s7, [#allocation4]  }
 0x2be   :  { %507 = dma.done.wait [#allocation4], 16  }
 0x2bf   :  { %508 = vsyncadd [#allocation4], 4294967280 }
 0x2c0   :  { %380 = vsyncpa [#allocation4], 1 }

</bundles_post_ra>
